<compile_context>
chip_gen: v6e
topology: v6e:2x2x1
jax: 0.10.0
libtpu: 0.0.40
codegen_flags: <defaults>
</compile_context>

<pallas_src>
import functools
import math

import jax
import jax.numpy as jnp
from jax.experimental import pallas as pl
from jax.experimental.pallas import tpu as pltpu


def _round_up(x, m):
    return ((x + m - 1) // m) * m


# contract dim 1 of both operands: (M, K) x (N, K) -> (M, N), no transpose
_CONTRACT_DIM1 = (((1,), (1,)), ((), ()))


def _bilinear_layer_kernel(x_ref, w1_ref, c_ref, w2_ref, b_ref, o_ref, acc_ref,
                           *, activation):
    """One SimplifiedBilinear layer: o = act(x @ W1^T + ctx @ W2^T + b)."""
    k = pl.program_id(2)

    @pl.when(k == 0)
    def _init():
        # Seed the accumulator with the (small) context path: ctx @ W2^T.
        acc_ref[...] = jax.lax.dot_general(
            c_ref[...], w2_ref[...], dimension_numbers=_CONTRACT_DIM1,
            preferred_element_type=jnp.float32)

    # Main path: stream K-blocks of x / W1 into the resident accumulator.
    acc_ref[...] += jax.lax.dot_general(
        x_ref[...], w1_ref[...], dimension_numbers=_CONTRACT_DIM1,
        preferred_element_type=jnp.float32)

    @pl.when(k == pl.num_programs(2) - 1)
    def _epilogue():
        y = acc_ref[...] + b_ref[...]          # (tm, tn) + (1, tn), f32
        if activation == "relu":
            y = jnp.maximum(y, 0.0)
        elif activation == "tanh":
            y = jnp.tanh(y)
        o_ref[...] = y.astype(o_ref.dtype)


def fused_bilinear_layer(x1, x2, w1, b1, w2, *, activation=None,
                         compute_dtype=jnp.float32,
                         tm_max=256, tn_max=256, tk_max=512):
    """Pallas forward of SimplifiedBilinear (+ optional fused activation).

      y = act(x1 @ w1.T + b1 + x2 @ w2.T)

    x1: (M, K1), x2: (M, K2), w1: (N, K1), w2: (N, K2), b1: (N,)

    compute_dtype can be set to jnp.bfloat16 to halve HBM bytes for the weight
    stream and use the bf16 MXU path; accumulation / epilogue stay in f32.
    """
    M, K1 = x1.shape
    M2, K2 = x2.shape
    assert M == M2, "input / context batch mismatch"
    N = w1.shape[0]
    assert w1.shape == (N, K1) and w2.shape == (N, K2) and b1.shape == (N,)

    # Pad to (8, 128)-aligned, tile-divisible shapes. Zero padding is exact:
    # padded K columns contribute 0, padded M rows / N columns are sliced off.
    Mp = _round_up(max(M, 8), 8)
    tm = min(tm_max, Mp)
    Mp = _round_up(Mp, tm)

    Np = _round_up(max(N, 128), 128)
    tn = min(tn_max, Np)
    Np = _round_up(Np, tn)

    K1p = _round_up(max(K1, 128), 128)
    tk = min(tk_max, K1p)
    K1p = _round_up(K1p, tk)

    K2p = _round_up(max(K2, 128), 128)   # context dim stays a single block

    x1p = jnp.pad(x1, ((0, Mp - M), (0, K1p - K1))).astype(compute_dtype)
    x2p = jnp.pad(x2, ((0, Mp - M), (0, K2p - K2))).astype(compute_dtype)
    w1p = jnp.pad(w1, ((0, Np - N), (0, K1p - K1))).astype(compute_dtype)
    w2p = jnp.pad(w2, ((0, Np - N), (0, K2p - K2))).astype(compute_dtype)
    # Lane-dense (1, Np) bias row, kept in f32 for the epilogue.
    b1p = jnp.pad(b1, (0, Np - N)).reshape(1, Np).astype(jnp.float32)

    grid = (Mp // tm, Np // tn, K1p // tk)

    out = pl.pallas_call(
        functools.partial(_bilinear_layer_kernel, activation=activation),
        out_shape=jax.ShapeDtypeStruct((Mp, Np), jnp.float32),
        grid_spec=pltpu.PrefetchScalarGridSpec(
            num_scalar_prefetch=0,
            grid=grid,
            in_specs=[
                pl.BlockSpec((tm, tk), lambda i, j, k: (i, k)),    # x1
                pl.BlockSpec((tn, tk), lambda i, j, k: (j, k)),    # w1 (out, in)
                pl.BlockSpec((tm, K2p), lambda i, j, k: (i, 0)),   # ctx
                pl.BlockSpec((tn, K2p), lambda i, j, k: (j, 0)),   # w2 (out, in)
                pl.BlockSpec((1, tn), lambda i, j, k: (0, j)),     # bias row
            ],
            out_specs=pl.BlockSpec((tm, tn), lambda i, j, k: (i, j)),
            scratch_shapes=[pltpu.VMEM((tm, tn), jnp.float32)],
        ),
        compiler_params=pltpu.CompilerParams(
            dimension_semantics=("parallel", "parallel", "arbitrary"),
            vmem_limit_bytes=32 * 1024 * 1024,   # safe on v5e/v6e/v7x for these tiles
        ),
    )(x1p, w1p, x2p, w2p, b1p)

    return out[:M, :N]


def context_bilinear_mlp_forward(inp, context, params, *, nonlinearity="relu",
                                 use_nonlinearity_output=False,
                                 compute_dtype=jnp.float32):
    """Forward pass of ContextBilinearMLP using the fused Pallas layer kernel."""
    batch = inp.shape[0]
    x = inp.reshape(batch, -1)          # .view(batch, input_dim)
    c = context.reshape(batch, -1)      # .view(batch, context_dim)

    hidden = x
    for (w1, b1, w2) in params["layers"]:
        hidden = fused_bilinear_layer(hidden, c, w1, b1, w2,
                                      activation=nonlinearity,
                                      compute_dtype=compute_dtype)
    wf1, bf1, wf2 = params["fc"]
    out = fused_bilinear_layer(
        hidden, c, wf1, bf1, wf2,
        activation=nonlinearity if use_nonlinearity_output else None,
        compute_dtype=compute_dtype)
    return out


def init_params(key, input_dim, context_dim, hidden_dim, output_dim,
                num_hidden_layers):
    """Deterministic nn.Linear-style init (uniform +-1/sqrt(fan_in))."""
    def linear_init(k, out_f, in_f, with_bias=True):
        kw, kb = jax.random.split(k)
        bound = 1.0 / math.sqrt(in_f)
        w = jax.random.uniform(kw, (out_f, in_f), minval=-bound, maxval=bound,
                               dtype=jnp.float32)
        b = (jax.random.uniform(kb, (out_f,), minval=-bound, maxval=bound,
                                dtype=jnp.float32) if with_bias else None)
        return w, b

    keys = jax.random.split(key, num_hidden_layers + 1)
    layers = []
    for i in range(num_hidden_layers):
        k1, k2 = jax.random.split(keys[i])
        in1 = input_dim if i == 0 else hidden_dim
        w1, b1 = linear_init(k1, hidden_dim, in1)               # path1 (bias)
        w2, _ = linear_init(k2, hidden_dim, context_dim, False)  # path2 (no bias)
        layers.append((w1, b1, w2))
    k1, k2 = jax.random.split(keys[-1])
    in1 = input_dim if num_hidden_layers == 0 else hidden_dim
    wf1, bf1 = linear_init(k1, output_dim, in1)
    wf2, _ = linear_init(k2, output_dim, context_dim, False)
    return {"layers": layers, "fc": (wf1, bf1, wf2)}


def reference_forward(inp, context, params, *, nonlinearity="relu",
                      use_nonlinearity_output=False):
    """Plain-JAX mirror of the PyTorch forward, for verification."""
    act = {"relu": jax.nn.relu, "tanh": jnp.tanh}[nonlinearity]
    batch = inp.shape[0]
    x = inp.reshape(batch, -1)
    c = context.reshape(batch, -1)
    h = x
    for (w1, b1, w2) in params["layers"]:
        h = act(h @ w1.T + b1 + c @ w2.T)
    wf1, bf1, wf2 = params["fc"]
    out = h @ wf1.T + bf1 + c @ wf2.T
    if use_nonlinearity_output:
        out = act(out)
    return out


if __name__ == "__main__":
    # Shapes consistent with the module defaults.
    batch = 8
    input_dim, context_dim, hidden_dim, output_dim = 2, 2, 8, 2
    num_hidden_layers = 3

    key = jax.random.PRNGKey(0)
    k_params, k_in, k_ctx = jax.random.split(key, 3)

    params = init_params(k_params, input_dim, context_dim, hidden_dim,
                         output_dim, num_hidden_layers)
    inp = jax.random.normal(k_in, (batch, input_dim), dtype=jnp.float32)
    ctx = jax.random.normal(k_ctx, (batch, context_dim), dtype=jnp.float32)

    y = context_bilinear_mlp_forward(inp, ctx, params, nonlinearity="relu",
                                     use_nonlinearity_output=False)
    y = jax.block_until_ready(y)

    y_ref = reference_forward(inp, ctx, params, nonlinearity="relu",
                              use_nonlinearity_output=False)

    assert y.shape == (batch, output_dim)
    assert jnp.allclose(y, y_ref, atol=1e-4, rtol=1e-4), "mismatch vs reference"

    print("KERNEL_OK")
</pallas_src>

<mosaic_0001>
module attributes {stable_mosaic.version = 11 : i64} {
  func.func @_bilinear_layer_kernel(%arg0: i32, %arg1: i32, %arg2: i32, %arg3: memref<8x128xf32, #tpu.memory_space<vmem>>, %arg4: memref<128x128xf32, #tpu.memory_space<vmem>>, %arg5: memref<8x128xf32, #tpu.memory_space<vmem>>, %arg6: memref<128x128xf32, #tpu.memory_space<vmem>>, %arg7: memref<1x128xf32, #tpu.memory_space<vmem>>, %arg8: memref<8x128xf32, #tpu.memory_space<vmem>>, %arg9: memref<8x128xf32, #tpu.memory_space<vmem>>) attributes {dimension_semantics = [#tpu.dimension_semantics<parallel>, #tpu.dimension_semantics<parallel>, #tpu.dimension_semantics<arbitrary>], iteration_bounds = array<i64: 1, 1, 1>, scalar_prefetch = 0 : i64, scratch_operands = 1 : i64, tpu.core_type = #tpu.core_type<tc>, window_params = [{transform_indices = @transform_0, window_bounds = array<i64: 8, 128>}, {transform_indices = @transform_1, window_bounds = array<i64: 128, 128>}, {transform_indices = @transform_2, window_bounds = array<i64: 8, 128>}, {transform_indices = @transform_3, window_bounds = array<i64: 128, 128>}, {transform_indices = @transform_4, window_bounds = array<i64: 1, 128>}, {transform_indices = @transform_5, window_bounds = array<i64: 8, 128>}]} {
    %c0_i32 = arith.constant 0 : i32
    %0 = arith.cmpi eq, %arg2, %c0_i32 : i32
    %1 = arith.extui %0 : i1 to i32
    %c0_i32_0 = arith.constant 0 : i32
    %2 = arith.cmpi ne, %1, %c0_i32_0 : i32
    scf.if %2 {
      %c0_10 = arith.constant 0 : index
      %c0_11 = arith.constant 0 : index
      %12 = vector.load %arg5[%c0_10, %c0_11] : memref<8x128xf32, #tpu.memory_space<vmem>>, vector<8x128xf32>
      %c0_12 = arith.constant 0 : index
      %c0_13 = arith.constant 0 : index
      %13 = vector.load %arg6[%c0_12, %c0_13] : memref<128x128xf32, #tpu.memory_space<vmem>>, vector<128x128xf32>
      %cst_14 = arith.constant dense<0.000000e+00> : vector<8x128xf32>
      %14 = tpu.matmul %12, %13, %cst_14 {dimension_numbers = #tpu.dot_dimension_numbers<[1], [1], [0], [0], [0, 0, 1, 0], [], []>} : vector<8x128xf32>, vector<128x128xf32>, vector<8x128xf32> -> vector<8x128xf32>
      %c0_15 = arith.constant 0 : index
      %c0_16 = arith.constant 0 : index
      %15 = vector.load %arg9[%c0_15, %c0_16] : memref<8x128xf32, #tpu.memory_space<vmem>>, vector<8x128xf32>
      tpu.vector_store %arg9[%c0_15, %c0_16], %14 {strides = array<i32>} : memref<8x128xf32, #tpu.memory_space<vmem>>, vector<8x128xf32>,
    } else {
    }
    %c0 = arith.constant 0 : index
    %c0_1 = arith.constant 0 : index
    %3 = vector.load %arg9[%c0, %c0_1] : memref<8x128xf32, #tpu.memory_space<vmem>>, vector<8x128xf32>
    %c0_2 = arith.constant 0 : index
    %c0_3 = arith.constant 0 : index
    %4 = vector.load %arg3[%c0_2, %c0_3] : memref<8x128xf32, #tpu.memory_space<vmem>>, vector<8x128xf32>
    %c0_4 = arith.constant 0 : index
    %c0_5 = arith.constant 0 : index
    %5 = vector.load %arg4[%c0_4, %c0_5] : memref<128x128xf32, #tpu.memory_space<vmem>>, vector<128x128xf32>
    %cst = arith.constant dense<0.000000e+00> : vector<8x128xf32>
    %6 = tpu.matmul %4, %5, %cst {dimension_numbers = #tpu.dot_dimension_numbers<[1], [1], [0], [0], [0, 0, 1, 0], [], []>} : vector<8x128xf32>, vector<128x128xf32>, vector<8x128xf32> -> vector<8x128xf32>
    %7 = arith.addf %3, %6 : vector<8x128xf32>
    %c0_6 = arith.constant 0 : index
    %c0_7 = arith.constant 0 : index
    %8 = vector.load %arg9[%c0_6, %c0_7] : memref<8x128xf32, #tpu.memory_space<vmem>>, vector<8x128xf32>
    tpu.vector_store %arg9[%c0_6, %c0_7], %7 {strides = array<i32>} : memref<8x128xf32, #tpu.memory_space<vmem>>, vector<8x128xf32>,
    %c0_i32_8 = arith.constant 0 : i32
    %9 = arith.cmpi eq, %arg2, %c0_i32_8 : i32
    %10 = arith.extui %9 : i1 to i32
    %c0_i32_9 = arith.constant 0 : i32
    %11 = arith.cmpi ne, %10, %c0_i32_9 : i32
    scf.if %11 {
      %c0_10 = arith.constant 0 : index
      %c0_11 = arith.constant 0 : index
      %12 = vector.load %arg9[%c0_10, %c0_11] : memref<8x128xf32, #tpu.memory_space<vmem>>, vector<8x128xf32>
      %c0_12 = arith.constant 0 : index
      %c0_13 = arith.constant 0 : index
      %13 = vector.load %arg7[%c0_12, %c0_13] : memref<1x128xf32, #tpu.memory_space<vmem>>, vector<1x128xf32>
      %14 = vector.broadcast %13 : vector<1x128xf32> to vector<8x128xf32>
      %15 = arith.addf %12, %14 : vector<8x128xf32>
      %cst_14 = arith.constant 0.000000e+00 : f32
      %16 = vector.broadcast %cst_14 : f32 to vector<8x128xf32>
      %17 = arith.maximumf %15, %16 : vector<8x128xf32>
      %c0_15 = arith.constant 0 : index
      %c0_16 = arith.constant 0 : index
      %18 = vector.load %arg8[%c0_15, %c0_16] : memref<8x128xf32, #tpu.memory_space<vmem>>, vector<8x128xf32>
      tpu.vector_store %arg8[%c0_15, %c0_16], %17 {strides = array<i32>} : memref<8x128xf32, #tpu.memory_space<vmem>>, vector<8x128xf32>,
    } else {
    }
    return
  }
  func.func @transform_0(%arg0: i32, %arg1: i32, %arg2: i32) -> (i32, i32) {
    %c0_i32 = arith.constant 0 : i32
    return %arg0, %arg2 : i32, i32
  }
  func.func @transform_1(%arg0: i32, %arg1: i32, %arg2: i32) -> (i32, i32) {
    %c0_i32 = arith.constant 0 : i32
    return %arg1, %arg2 : i32, i32
  }
  func.func @transform_2(%arg0: i32, %arg1: i32, %arg2: i32) -> (i32, i32) {
    %c0_i32 = arith.constant 0 : i32
    %c0_i32_0 = arith.constant 0 : i32
    return %arg0, %c0_i32 : i32, i32
  }
  func.func @transform_3(%arg0: i32, %arg1: i32, %arg2: i32) -> (i32, i32) {
    %c0_i32 = arith.constant 0 : i32
    %c0_i32_0 = arith.constant 0 : i32
    return %arg1, %c0_i32 : i32, i32
  }
  func.func @transform_4(%arg0: i32, %arg1: i32, %arg2: i32) -> (i32, i32) {
    %c0_i32 = arith.constant 0 : i32
    %c0_i32_0 = arith.constant 0 : i32
    return %c0_i32, %arg1 : i32, i32
  }
  func.func @transform_5(%arg0: i32, %arg1: i32, %arg2: i32) -> (i32, i32) {
    %c0_i32 = arith.constant 0 : i32
    return %arg0, %arg1 : i32, i32
  }
}

</mosaic_0001>

<bundles_post_ra>
// kernel: tpu_custom_call.1
= control target key start
LH: loop header
LB: loop body
LE: loop exit
PB: predicated region body
PF: predicated region fallthrough
CT: control target
= control target key end

     0   :  { %10 = vsyncpa [#allocation4], 0  ;;  %s604_s0 = inlined_call_operand.hbm [shape: f32[8,128], index: 0, kind: input, shape index: {}]   ;;  %s605_s1 = inlined_call_operand.hbm [shape: f32[128,128], index: 1, kind: input, shape index: {}]   ;;  %s606_s2 = inlined_call_operand.hbm [shape: f32[8,128], index: 2, kind: input, shape index: {}]   ;;  %s607_s3 = inlined_call_operand.hbm [shape: f32[128,128], index: 3, kind: input, shape index: {}]   ;;  %s608_s4 = inlined_call_operand.vmem [shape: f32[1,128], index: 4, kind: input, shape index: {}]   ;;  %s609_s5 = inlined_call_operand.hbm [shape: f32[8,128], index: 5, kind: output, shape index: {}]  }
   0x1   :  { %11 = vsyncpa [#allocation7], 0 }
   0x2   :  { %12 = vsyncpa [#allocation10], 0 }
   0x3   :  { %13 = vsyncpa [#allocation5], 0  ;;  %s507_s18 = smov [#allocation6]  }
   0x4   :  { %s29_s19 = sshll.u32 %s507_s18, 4  ;;  %s30_s19 = int_to_ptr.vmem [resolvable:$true] %s29_s19 }
   0x5   :  { %s407_s20 = scalar_lea.vmem %s30_s19, 2048  ;;  %p412_p1 = scmp.lt.s32.totalorder %s30_s19, %s30_s19 }
   0x6   :  { %p408_p0 = scmp.ne.s32.totalorder %s30_s19, %s407_s20  ;;  %p413_p2 = scmp.lt.s32.totalorder %s407_s20, %s407_s20 }
   0x8   :  { %p414_p3 = por %p413_p2, %p412_p1 }
   0xa   :  { %p415_p4 = pnand %p414_p3, %p408_p0 }
   0xc   :  { %418 = shalt.err (!%p415_p4)
}
   0xd   :  { %s508_s21 = smov 128   ;;  %s509_s22 = smov 8  }
   0xe   :  { %35 = dma.hbm_to_vmem [thread:$0]  %s605_s1, 2048, %s30_s19, [#allocation7], %s508_s21, %s508_s21, %s509_s22  }
   0xf   :  { %s510_s25 = smov [#allocation3]   ;;  %s511_s27 = smov [#allocation8]  }
  0x10   :  { %s20_s26 = sshll.u32 %s510_s25, 4  ;;  %s42_s28 = sshll.u32 %s511_s27, 4  ;;  %s21_s26 = int_to_ptr.vmem [resolvable:$true] %s20_s26  ;;  %s43_s28 = int_to_ptr.vmem [resolvable:$true] %s42_s28 }
  0x11   :  { %s427_s29 = scalar_lea.vmem %s21_s26, 128  ;;  %p432_p6 = scmp.lt.s32.totalorder %s21_s26, %s21_s26 }
  0x12   :  { %p428_p5 = scmp.ne.s32.totalorder %s21_s26, %s427_s29  ;;  %p433_p7 = scmp.lt.s32.totalorder %s427_s29, %s427_s29 }
  0x14   :  { %p434_p8 = por %p433_p7, %p432_p6 }
  0x16   :  { %p435_p9 = pnand %p434_p8, %p428_p5 }
  0x18   :  { %438 = shalt.err (!%p435_p9)
}
  0x19   :  { %23 = dma.hbm_to_vmem [thread:$0]  %s604_s0, 128, %s21_s26, [#allocation4]  }
  0x1a   :  { %s447_s7 = scalar_lea.vmem %s43_s28, 128  ;;  %p452_p11 = scmp.lt.s32.totalorder %s43_s28, %s43_s28 }
  0x1b   :  { %p448_p10 = scmp.ne.s32.totalorder %s43_s28, %s447_s7  ;;  %p453_p12 = scmp.lt.s32.totalorder %s447_s7, %s447_s7 }
  0x1d   :  { %p454_p13 = por %p453_p12, %p452_p11 }
  0x1f   :  { %p455_p0 = pnand %p454_p13, %p448_p10 }
  0x21   :  { %458 = shalt.err (!%p455_p0)
}
  0x22   :  { %45 = dma.hbm_to_vmem [thread:$0]  %s606_s2, 128, %s43_s28, [#allocation7]  }
  0x23   :  { %s512_s9 = smov [#allocation9]  }
  0x24   :  { %s51_s10 = sshll.u32 %s512_s9, 4  ;;  %s52_s10 = int_to_ptr.vmem [resolvable:$true] %s51_s10 }
  0x25   :  { %s467_s11 = scalar_lea.vmem %s52_s10, 2048  ;;  %p472_p2 = scmp.lt.s32.totalorder %s52_s10, %s52_s10 }
  0x26   :  { %p468_p1 = scmp.ne.s32.totalorder %s52_s10, %s467_s11  ;;  %p473_p3 = scmp.lt.s32.totalorder %s467_s11, %s467_s11 }
  0x28   :  { %p474_p4 = por %p473_p3, %p472_p2 }
  0x2a   :  { %p475_p5 = pnand %p474_p4, %p468_p1 }
  0x2c   :  { %478 = shalt.err (!%p475_p5)
}
  0x2d   :  { %57 = dma.hbm_to_vmem [thread:$0]  %s607_s3, 2048, %s52_s10, [#allocation10], %s508_s21, %s508_s21, %s509_s22  }
  0x2e   :  { %499 = dma.done.wait [#allocation4], 128  }
  0x2f   :  { %500 = vsyncadd [#allocation4], 4294967168 }
  0x30   :  { %501 = dma.done.wait [#allocation7], 2176  }
  0x31   :  { %502 = vsyncadd [#allocation7], 4294965120 }
  0x32   :  { %503 = dma.done.wait [#allocation10], 2048  }
  0x33   :  { %504 = vsyncadd [#allocation10], 4294965248  ;;  %v513_v0 = vmov 0.0   ;;  %vm514_vm0 = vmmov 0   ;;  %v92_v1 = vld [vmem:[#allocation9 + $0x78] sm:$0xff]  ;;  %v181_v2 = vld [vmem:[#allocation6 + $0x78] sm:$0xff] }
  0x34   :  { %320 = vmatprep.subr.mxu0 %v513_v0  ;;  %355 = vmatprep.subr.mxu1 %v513_v0  ;;  %v91_v3 = vld [vmem:[#allocation9 + $0x70] sm:$0xff]  ;;  %v180_v4 = vld [vmem:[#allocation6 + $0x70] sm:$0xff]  ;;  %v179_v6 = vld [vmem:[#allocation6 + $0x68] sm:$0xff]  ;;  %s515_s13 = smov [#allocation11]  }
  0x35   :  { %352 = vmatprep.mubr.msk.f32.mxu0 %vm514_vm0, %v513_v0  ;;  %387 = vmatprep.mubr.msk.f32.mxu1 %vm514_vm0, %v513_v0  ;;  %v90_v5 = vld [vmem:[#allocation9 + $0x68] sm:$0xff]  ;;  %v89_v7 = vld [vmem:[#allocation9 + $0x60] sm:$0xff]  ;;  %v178_v8 = vld [vmem:[#allocation6 + $0x60] sm:$0xff]  ;;  %s274_s14 = sshll.u32 %s515_s13, 4  ;;  %s275_s14 = int_to_ptr.vmem [resolvable:$true] %s274_s14 }
  0x36   :  { %321 = vmatpush3.xpose.msra.mxu0 %v92_v1  ;;  %356 = vmatpush3.xpose.msra.mxu1 %v181_v2  ;;  %v88_v9 = vld [vmem:[#allocation9 + $0x58] sm:$0xff]  ;;  %v177_v10 = vld [vmem:[#allocation6 + $0x58] sm:$0xff]  ;;  %v176_v12 = vld [vmem:[#allocation6 + $0x50] sm:$0xff]  ;;  %s479_s15 = scalar_lea.vmem %s275_s14, 128  ;;  %p484_p7 = scmp.lt.s32.totalorder %s275_s14, %s275_s14 }
  0x37   :  { %322 = vmatprep.subr.mxu0 %v513_v0  ;;  %357 = vmatprep.subr.mxu1 %v513_v0  ;;  %v87_v11 = vld [vmem:[#allocation9 + $0x50] sm:$0xff]  ;;  %v86_v13 = vld [vmem:[#allocation9 + $0x48] sm:$0xff]  ;;  %v175_v14 = vld [vmem:[#allocation6 + $0x48] sm:$0xff]  ;;  %p480_p6 = scmp.ne.s32.totalorder %s275_s14, %s479_s15  ;;  %p485_p8 = scmp.lt.s32.totalorder %s479_s15, %s479_s15 }
  0x38   :  { %v85_v15 = vld [vmem:[#allocation9 + $0x40] sm:$0xff]  ;;  %v174_v16 = vld [vmem:[#allocation6 + $0x40] sm:$0xff]  ;;  %v173_v18 = vld [vmem:[#allocation6 + $0x38] sm:$0xff] }
  0x39   :  { %v84_v17 = vld [vmem:[#allocation9 + $0x38] sm:$0xff]  ;;  %v83_v19 = vld [vmem:[#allocation9 + $0x30] sm:$0xff]  ;;  %v172_v20 = vld [vmem:[#allocation6 + $0x30] sm:$0xff]  ;;  %p486_p9 = por %p485_p8, %p484_p7 }
  0x3a   :  { %323 = vmatpush3.xpose.msra.mxu0 %v91_v3  ;;  %358 = vmatpush3.xpose.msra.mxu1 %v180_v4  ;;  %v82_v21 = vld [vmem:[#allocation9 + $0x28] sm:$0xff]  ;;  %v171_v22 = vld [vmem:[#allocation6 + $0x28] sm:$0xff]  ;;  %v170_v24 = vld [vmem:[#allocation6 + $0x20] sm:$0xff] }
  0x3b   :  { %324 = vmatprep.subr.mxu0 %v513_v0  ;;  %359 = vmatprep.subr.mxu1 %v513_v0  ;;  %v81_v23 = vld [vmem:[#allocation9 + $0x20] sm:$0xff]  ;;  %v80_v25 = vld [vmem:[#allocation9 + $0x18] sm:$0xff]  ;;  %v169_v26 = vld [vmem:[#allocation6 + $0x18] sm:$0xff]  ;;  %p487_p10 = pnand %p486_p9, %p480_p6 }
  0x3c   :  { %v79_v27 = vld [vmem:[#allocation9 + $0x10] sm:$0xff]  ;;  %v168_v28 = vld [vmem:[#allocation6 + $0x10] sm:$0xff]  ;;  %v167_v30 = vld [vmem:[#allocation6 + $0x8] sm:$0xff] }
  0x3d   :  { %v78_v29 = vld [vmem:[#allocation9 + $0x8] sm:$0xff]  ;;  %v77_v31 = vld [vmem:[#allocation9] sm:$0xff]  ;;  %v166_v32 = vld [vmem:[#allocation6] sm:$0xff] }
  0x3e   :  { %325 = vmatpush3.xpose.msra.mxu0 %v90_v5  ;;  %360 = vmatpush3.xpose.msra.mxu1 %v179_v6  ;;  %v76_v33 = vld [vmem:[#allocation8] sm:$0xff]  ;;  %v165_v34 = vld [vmem:[#allocation3] sm:$0xff] }
  0x3f   :  { %326 = vmatprep.subr.mxu0 %v513_v0  ;;  %361 = vmatprep.subr.mxu1 %v513_v0  ;;  %v285_v37 = vld [vmem:[%s608_s4] ss:$0 sm:$0xff] }
  0x42   :  { %327 = vmatpush3.xpose.msra.mxu0 %v89_v7  ;;  %362 = vmatpush3.xpose.msra.mxu1 %v178_v8 }
  0x43   :  { %328 = vmatprep.subr.mxu0 %v513_v0  ;;  %363 = vmatprep.subr.mxu1 %v513_v0 }
  0x46   :  { %329 = vmatpush3.xpose.msra.mxu0 %v88_v9  ;;  %364 = vmatpush3.xpose.msra.mxu1 %v177_v10 }
  0x47   :  { %330 = vmatprep.subr.mxu0 %v513_v0  ;;  %365 = vmatprep.subr.mxu1 %v513_v0 }
  0x4a   :  { %331 = vmatpush3.xpose.msra.mxu0 %v87_v11  ;;  %366 = vmatpush3.xpose.msra.mxu1 %v176_v12 }
  0x4b   :  { %332 = vmatprep.subr.mxu0 %v513_v0  ;;  %367 = vmatprep.subr.mxu1 %v513_v0 }
  0x4e   :  { %333 = vmatpush3.xpose.msra.mxu0 %v86_v13  ;;  %368 = vmatpush3.xpose.msra.mxu1 %v175_v14 }
  0x4f   :  { %334 = vmatprep.subr.mxu0 %v513_v0  ;;  %369 = vmatprep.subr.mxu1 %v513_v0 }
  0x52   :  { %335 = vmatpush3.xpose.msra.mxu0 %v85_v15  ;;  %370 = vmatpush3.xpose.msra.mxu1 %v174_v16 }
  0x53   :  { %336 = vmatprep.subr.mxu0 %v513_v0  ;;  %371 = vmatprep.subr.mxu1 %v513_v0 }
  0x56   :  { %337 = vmatpush3.xpose.msra.mxu0 %v84_v17  ;;  %372 = vmatpush3.xpose.msra.mxu1 %v173_v18 }
  0x57   :  { %338 = vmatprep.subr.mxu0 %v513_v0  ;;  %373 = vmatprep.subr.mxu1 %v513_v0 }
  0x5a   :  { %339 = vmatpush3.xpose.msra.mxu0 %v83_v19  ;;  %374 = vmatpush3.xpose.msra.mxu1 %v172_v20 }
  0x5b   :  { %340 = vmatprep.subr.mxu0 %v513_v0  ;;  %375 = vmatprep.subr.mxu1 %v513_v0 }
  0x5e   :  { %341 = vmatpush3.xpose.msra.mxu0 %v82_v21  ;;  %376 = vmatpush3.xpose.msra.mxu1 %v171_v22 }
  0x5f   :  { %342 = vmatprep.subr.mxu0 %v513_v0  ;;  %377 = vmatprep.subr.mxu1 %v513_v0 }
  0x62   :  { %343 = vmatpush3.xpose.msra.mxu0 %v81_v23  ;;  %378 = vmatpush3.xpose.msra.mxu1 %v170_v24 }
  0x63   :  { %344 = vmatprep.subr.mxu0 %v513_v0  ;;  %379 = vmatprep.subr.mxu1 %v513_v0 }
  0x66   :  { %345 = vmatpush3.xpose.msra.mxu0 %v80_v25  ;;  %380 = vmatpush3.xpose.msra.mxu1 %v169_v26 }
  0x67   :  { %346 = vmatprep.subr.mxu0 %v513_v0  ;;  %381 = vmatprep.subr.mxu1 %v513_v0 }
  0x6a   :  { %347 = vmatpush3.xpose.msra.mxu0 %v79_v27  ;;  %382 = vmatpush3.xpose.msra.mxu1 %v168_v28 }
  0x6b   :  { %348 = vmatprep.subr.mxu0 %v513_v0  ;;  %383 = vmatprep.subr.mxu1 %v513_v0 }
  0x6e   :  { %349 = vmatpush3.xpose.msra.mxu0 %v78_v29  ;;  %384 = vmatpush3.xpose.msra.mxu1 %v167_v30 }
  0x6f   :  { %350 = vmatprep.subr.mxu0 %v513_v0  ;;  %385 = vmatprep.subr.mxu1 %v513_v0 }
  0x72   :  { %351 = vmatpush3.xpose.msra.mxu0 %v77_v31  ;;  %386 = vmatpush3.xpose.msra.mxu1 %v166_v32 }
  0x75   :  { %353 = vmatmul.mubr.f32.vlgmr.msra.gmra.mxu0 %v76_v33  ;;  %388 = vmatmul.mubr.f32.vlgmr.msra.gmra.mxu1 %v165_v34 }
 0x135   :  { %v159_v35 = vpop.f32.mrf.mxu0  ;;  %v248_v36 = vpop.f32.mrf.mxu1 }
 0x136   :  { %v252_v38 = vadd.f32 %v248_v36, %v159_v35 }
 0x137   :  { %v354_v39 = vpop.f32.mrf.mxu0  ;;  %v389_v40 = vpop.f32.mrf.mxu1 }
 0x138   :  { %v265_v41 = vadd.f32 %v285_v37, %v252_v38 }
 0x13a   :  { %v266_v42 = vmax.f32 %v265_v41, 0.0 }
 0x13c   :  { %267 = vst [vmem:[#allocation11] sm:$0xff] %v266_v42 }
 0x13d   :  { %490 = shalt.err (!%p487_p10)
}
 0x13e   :  { %277 = dma.vmem_to_hbm [thread:$0]  %s275_s14, 128, %s609_s5, [#allocation5]  }
 0x13f   :  { %505 = dma.done.wait [#allocation5], 128  }
 0x140   :  { %506 = vsyncadd [#allocation5], 4294967168 }
 0x141   :  { %281 = vsyncpa [#allocation4], 1 }
 0x142   :  { %282 = vsyncpa [#allocation7], 1 }
 0x143   :  { %283 = vsyncpa [#allocation10], 1 }
 0x144   :  { %284 = vsyncpa [#allocation5], 1 }

</bundles_post_ra>
